<compile_context>
chip_gen: v7x
topology: tpu7x:2x2x1
jax: 0.10.0
libtpu: 0.0.40
codegen_flags: <defaults>
</compile_context>

<pallas_src>
import numpy as np
import jax
import jax.numpy as jnp
from jax.experimental import pallas as pl
from jax.experimental.pallas import tpu as pltpu


def _round_up(v, m):
    return ((v + m - 1) // m) * m


def _vmem_capacity_bytes():
    """Per-TensorCore VMEM capacity; conservative fallback if query fails."""
    try:
        cap = getattr(pltpu.get_tpu_info(), "vmem_capacity_bytes", None)
        if cap:
            return int(cap)
    except Exception:
        pass
    return 64 * 1024 * 1024          # v7x per-TC size = most conservative


def make_ldam_loss(cls_num_list, max_m=0.5, s=30.0):
    """Returns fn(x, target) -> scalar loss, matching LDAMLoss.forward with
    reduction='none' followed by .mean() (i.e. mean over the batch)."""
    # m_list = 1 / n_c^{1/4}, rescaled so its max equals max_m
    m = 1.0 / np.sqrt(np.sqrt(np.asarray(cls_num_list, dtype=np.float64)))
    m = m * (max_m / np.max(m))
    m_host = np.asarray(m, dtype=np.float32)              # [C]
    s = float(s)

    def fn(x, target):
        N, C = x.shape
        in_dtype = x.dtype
        itemsize = jnp.dtype(in_dtype).itemsize

        # ---- generation-aware tile sizing (no host-side padding) ---------
        c_lanes = _round_up(C, 128)                        # VMEM lane padding
        vmem_cap = _vmem_capacity_bytes()
        # working-set budget: 32 MiB on 128 MiB parts (v5e/v6e), 16 MiB on
        # v7x (64 MiB per TC).
        budget = min(vmem_cap // 4, 32 * 1024 * 1024)
        # bytes of VMEM per batch row:
        #   2 x-pipeline buffers            : 2 * c_lanes * itemsize
        #   ~4 block-sized f32 temporaries  : 16 * c_lanes   (xb, z, exp, slack)
        #   lane-padded int32 target, 2 bufs: 2 * 128 * 4
        per_row = 2 * c_lanes * itemsize + 16 * c_lanes + 1024
        tile_n = max(8, (budget // per_row) // 8 * 8)
        tile_n = min(tile_n, 4096)                         # per-step overhead amortized
        if tile_n >= N:
            if N >= 16:
                # >= 2 grid tiles so both v7x TensorCores participate.
                tile_n = _round_up(-(-N // 2), 8)
            else:
                tile_n = N                                 # full dim -> legal
        num_tiles = -(-N // tile_n)                        # cdiv; last tile ragged

        tgt2d = target.astype(jnp.int32).reshape(N, 1)     # tiny, no logits copy
        m_row_arr = jnp.asarray(m_host.reshape(1, C))      # [1, C] f32

        def kernel(x_ref, tgt_ref, m_ref, o_ref):
            i = pl.program_id(0)
            xb = x_ref[...].astype(jnp.float32)            # [TN, C], upcast once
            tgt = tgt_ref[...]                             # [TN, 1] i32
            m_row = m_ref[...]                             # [1, C]  f32
            tn, c = xb.shape

            # boolean target mask via iota over the class (lane) axis
            col = jax.lax.broadcasted_iota(jnp.int32, (tn, c), 1)
            is_tgt = col == tgt                            # [TN, C] bool

            # subtract the per-class margin only at the target column
            z = s * jnp.where(is_tgt, xb - m_row, xb)      # [TN, C]

            # numerically-stable softmax cross-entropy: lse(z) - z[target]
            zmax = jnp.max(z, axis=-1, keepdims=True)
            sum_exp = jnp.sum(jnp.exp(z - zmax), axis=-1, keepdims=True)
            lse = zmax + jnp.log(sum_exp)
            z_t = jnp.sum(jnp.where(is_tgt, z, 0.0), axis=-1, keepdims=True)
            per_sample = lse - z_t                         # [TN, 1]

            # mask rows of the ragged last tile (their data is undefined)
            row = i * tn + jax.lax.broadcasted_iota(jnp.int32, (tn, 1), 0)
            per_sample = jnp.where(row < N, per_sample, 0.0)

            partial = jnp.sum(per_sample)
            # lane-dense, unmasked full-vreg store of this tile's partial sum
            o_ref[...] = jnp.full(o_ref.shape, partial, dtype=jnp.float32)

        cost = pl.CostEstimate(
            flops=6 * N * C,
            transcendentals=N * C + N,
            bytes_accessed=N * C * itemsize + N * 4 + C * 4
            + num_tiles * 8 * 128 * 4,
        )

        partials = pl.pallas_call(
            kernel,
            out_shape=jax.ShapeDtypeStruct((num_tiles, 8, 128), jnp.float32),
            grid=(num_tiles,),
            in_specs=[
                pl.BlockSpec((tile_n, C), lambda i: (i, 0)),   # logits (unpadded)
                pl.BlockSpec((tile_n, 1), lambda i: (i, 0)),   # targets
                pl.BlockSpec((1, C), lambda i: (0, 0)),        # margins (resident)
            ],
            out_specs=pl.BlockSpec((1, 8, 128), lambda i: (i, 0, 0)),
            compiler_params=pltpu.CompilerParams(
                dimension_semantics=("parallel",),
                vmem_limit_bytes=int(min(vmem_cap * 3 // 4, 96 * 1024 * 1024)),
            ),
            cost_estimate=cost,
        )(x, tgt2d, m_row_arr)

        # tiny final reduction: per-tile partial sums -> batch mean
        return jnp.sum(partials[:, 0, 0]) / N

    return fn


def _ref_loss(x, target, cls_num_list, max_m=0.5, s=30.0):
    """Pure-JAX reference of the same math (PyTorch LDAMLoss semantics)."""
    m = 1.0 / np.sqrt(np.sqrt(np.asarray(cls_num_list, np.float64)))
    m = m * (max_m / np.max(m))
    m_list = jnp.asarray(m, jnp.float32)
    onehot = jax.nn.one_hot(target, x.shape[1], dtype=jnp.float32)
    batch_m = (onehot @ m_list).reshape(-1, 1)
    z = s * jnp.where(onehot > 0, x.astype(jnp.float32) - batch_m,
                      x.astype(jnp.float32))
    return jnp.mean(jax.nn.logsumexp(z, axis=-1) - jnp.sum(onehot * z, axis=-1))


if __name__ == "__main__":
    # Small, deterministic example: batch N=8, C=16 classes.
    N, C = 8, 16
    key = jax.random.PRNGKey(0)
    kx, kt = jax.random.split(key)
    x = jax.random.normal(kx, (N, C), dtype=jnp.float32)
    target = jax.random.randint(kt, (N,), 0, C, dtype=jnp.int32)
    cls_num_list = [int(1000 * (0.7 ** i)) + 1 for i in range(C)]

    ldam_loss = make_ldam_loss(cls_num_list, max_m=0.5, s=30.0)
    loss = ldam_loss(x, target)
    jax.block_until_ready(loss)
    ref = _ref_loss(x, target, cls_num_list)
    assert jnp.allclose(loss, ref, rtol=1e-5, atol=1e-5), (loss, ref)

    # Second small config exercising a non-multiple-of-128 class axis and a
    # batch size that is not a multiple of 8 (full-dim row block).
    N2, C2 = 10, 200
    kx2, kt2 = jax.random.split(jax.random.PRNGKey(0), 2)
    x2 = jax.random.normal(kx2, (N2, C2), dtype=jnp.float32)
    t2 = jax.random.randint(kt2, (N2,), 0, C2, dtype=jnp.int32)
    cls2 = [int(500 * (0.9 ** i)) + 1 for i in range(C2)]
    loss2 = make_ldam_loss(cls2, max_m=0.5, s=30.0)(x2, t2)
    jax.block_until_ready(loss2)
    ref2 = _ref_loss(x2, t2, cls2)
    assert jnp.allclose(loss2, ref2, rtol=1e-5, atol=1e-5), (loss2, ref2)

    # Third config exercising the ragged last row-tile / >=2-tile megacore
    # split path (N >= 16, tile_n < N).
    N3, C3 = 37, 160
    kx3, kt3 = jax.random.split(jax.random.PRNGKey(0), 2)
    x3 = jax.random.normal(kx3, (N3, C3), dtype=jnp.float32)
    t3 = jax.random.randint(kt3, (N3,), 0, C3, dtype=jnp.int32)
    cls3 = [int(800 * (0.85 ** i)) + 1 for i in range(C3)]
    loss3 = make_ldam_loss(cls3, max_m=0.5, s=30.0)(x3, t3)
    jax.block_until_ready(loss3)
    ref3 = _ref_loss(x3, t3, cls3)
    assert jnp.allclose(loss3, ref3, rtol=1e-5, atol=1e-5), (loss3, ref3)

    print("KERNEL_OK")
</pallas_src>

<mosaic_0001>
module attributes {stable_mosaic.version = 11 : i64} {
  func.func @kernel(%arg0: i32, %arg1: memref<8x16xf32, #tpu.memory_space<vmem>>, %arg2: memref<8x1xi32, #tpu.memory_space<vmem>>, %arg3: memref<1x16xf32, #tpu.memory_space<vmem>>, %arg4: memref<1x8x128xf32, #tpu.memory_space<vmem>>) attributes {dimension_semantics = [#tpu.dimension_semantics<parallel>], iteration_bounds = array<i64: 1>, scalar_prefetch = 0 : i64, scratch_operands = 0 : i64, tpu.core_type = #tpu.core_type<tc>, window_params = [{transform_indices = @transform_0, window_bounds = array<i64: 8, 16>}, {transform_indices = @transform_1, window_bounds = array<i64: 8, 1>}, {pipeline_mode = #tpu.pipeline_mode<synchronous>, transform_indices = @transform_2, window_bounds = array<i64: 1, 16>}, {transform_indices = @transform_3, window_bounds = array<i64: 1, 8, 128>}]} {
    %c0 = arith.constant 0 : index
    %c0_0 = arith.constant 0 : index
    %0 = vector.load %arg1[%c0, %c0_0] : memref<8x16xf32, #tpu.memory_space<vmem>>, vector<8x16xf32>
    %c0_1 = arith.constant 0 : index
    %c0_2 = arith.constant 0 : index
    %1 = vector.load %arg2[%c0_1, %c0_2] : memref<8x1xi32, #tpu.memory_space<vmem>>, vector<8x1xi32>
    %c0_3 = arith.constant 0 : index
    %c0_4 = arith.constant 0 : index
    %2 = vector.load %arg3[%c0_3, %c0_4] : memref<1x16xf32, #tpu.memory_space<vmem>>, vector<1x16xf32>
    %3 = tpu.iota {dimensions = array<i32: 1>} : vector<8x16xi32>
    %4 = vector.broadcast %1 : vector<8x1xi32> to vector<8x16xi32>
    %5 = arith.cmpi eq, %3, %4 : vector<8x16xi32>
    %6 = vector.broadcast %2 : vector<1x16xf32> to vector<8x16xf32>
    %7 = arith.subf %0, %6 : vector<8x16xf32>
    %8 = arith.select %5, %7, %0 : vector<8x16xi1>, vector<8x16xf32>
    %cst = arith.constant 3.000000e+01 : f32
    %9 = vector.broadcast %cst : f32 to vector<8x16xf32>
    %10 = arith.mulf %9, %8 : vector<8x16xf32>
    %cst_5 = arith.constant dense<0xFF800000> : vector<8xf32>
    %11 = vector.multi_reduction <maximumf>, %10, %cst_5 [1] : vector<8x16xf32> to vector<8xf32>
    %12 = vector.shape_cast %11 : vector<8xf32> to vector<8x1xf32>
    %13 = vector.broadcast %12 : vector<8x1xf32> to vector<8x16xf32>
    %14 = arith.subf %10, %13 : vector<8x16xf32>
    %15 = math.exp %14 : vector<8x16xf32>
    %cst_6 = arith.constant dense<0.000000e+00> : vector<8xf32>
    %16 = vector.multi_reduction <add>, %15, %cst_6 [1] : vector<8x16xf32> to vector<8xf32>
    %17 = vector.shape_cast %16 : vector<8xf32> to vector<8x1xf32>
    %18 = math.log %17 : vector<8x1xf32>
    %19 = arith.addf %12, %18 : vector<8x1xf32>
    %cst_7 = arith.constant 0.000000e+00 : f32
    %20 = vector.broadcast %cst_7 : f32 to vector<8x16xf32>
    %21 = arith.select %5, %10, %20 : vector<8x16xi1>, vector<8x16xf32>
    %cst_8 = arith.constant dense<0.000000e+00> : vector<8xf32>
    %22 = vector.multi_reduction <add>, %21, %cst_8 [1] : vector<8x16xf32> to vector<8xf32>
    %23 = vector.shape_cast %22 : vector<8xf32> to vector<8x1xf32>
    %24 = arith.subf %19, %23 : vector<8x1xf32>
    %c8_i32 = arith.constant 8 : i32
    %25 = arith.muli %arg0, %c8_i32 : i32
    %26 = tpu.iota {dimensions = array<i32: 0>} : vector<8x1xi32>
    %27 = vector.broadcast %25 : i32 to vector<8x1xi32>
    %28 = arith.addi %27, %26 : vector<8x1xi32>
    %c8_i32_9 = arith.constant 8 : i32
    %29 = vector.broadcast %c8_i32_9 : i32 to vector<8x1xi32>
    %30 = arith.cmpi slt, %28, %29 : vector<8x1xi32>
    %cst_10 = arith.constant 0.000000e+00 : f32
    %31 = vector.broadcast %cst_10 : f32 to vector<8x1xf32>
    %32 = arith.select %30, %24, %31 : vector<8x1xi1>, vector<8x1xf32>
    %33 = vector.shape_cast %32 : vector<8x1xf32> to vector<1x8x1xf32>
    %cst_11 = arith.constant dense<0.000000e+00> : vector<1xf32>
    %34 = vector.multi_reduction <add>, %33, %cst_11 [1, 2] : vector<1x8x1xf32> to vector<1xf32>
    %35 = vector.shape_cast %34 : vector<1xf32> to vector<1x1x1xf32>
    %36 = vector.extract %35[0, 0, 0] : f32 from vector<1x1x1xf32>
    %37 = vector.broadcast %36 : f32 to vector<1x8x128xf32>
    %c0_12 = arith.constant 0 : index
    %c0_13 = arith.constant 0 : index
    %c0_14 = arith.constant 0 : index
    %38 = vector.load %arg4[%c0_12, %c0_13, %c0_14] : memref<1x8x128xf32, #tpu.memory_space<vmem>>, vector<1x8x128xf32>
    tpu.vector_store %arg4[%c0_12, %c0_13, %c0_14], %37 {strides = array<i32>} : memref<1x8x128xf32, #tpu.memory_space<vmem>>, vector<1x8x128xf32>,
    return
  }
  func.func @transform_0(%arg0: i32) -> (i32, i32) {
    %c0_i32 = arith.constant 0 : i32
    %c0_i32_0 = arith.constant 0 : i32
    return %arg0, %c0_i32 : i32, i32
  }
  func.func @transform_1(%arg0: i32) -> (i32, i32) {
    %c0_i32 = arith.constant 0 : i32
    %c0_i32_0 = arith.constant 0 : i32
    return %arg0, %c0_i32 : i32, i32
  }
  func.func @transform_2(%arg0: i32) -> (i32, i32) {
    %c0_i32 = arith.constant 0 : i32
    %c0_i32_0 = arith.constant 0 : i32
    %c0_i32_1 = arith.constant 0 : i32
    return %c0_i32, %c0_i32_0 : i32, i32
  }
  func.func @transform_3(%arg0: i32) -> (i32, i32, i32) {
    %c0_i32 = arith.constant 0 : i32
    %c0_i32_0 = arith.constant 0 : i32
    %c0_i32_1 = arith.constant 0 : i32
    return %arg0, %c0_i32, %c0_i32_0 : i32, i32, i32
  }
}

</mosaic_0001>

<bundles_post_ra>
// kernel: tpu_custom_call.1
= control target key start
LH: loop header
LB: loop body
LE: loop exit
PB: predicated region body
PF: predicated region fallthrough
CT: control target
= control target key end

     0   :  { %v119_v1 = vmov 0   ;;  %s162_s0 = inlined_call_operand.vmem [shape: f32[8,16], index: 0, kind: input, shape index: {}]   ;;  %s163_s1 = inlined_call_operand.vmem [shape: s32[8,1], index: 1, kind: input, shape index: {}]   ;;  %s164_s2 = inlined_call_operand.vmem [shape: f32[1,16], index: 2, kind: input, shape index: {}]   ;;  %s165_s3 = inlined_call_operand.hbm [shape: f32[1,8,128], index: 3, kind: output, shape index: {}]  }
   0x1   :  { %v16_v0 = vld [vmem:[%s163_s1] sm:$0xff]  ;;  %90 = vset.pattern.permute.xlu0 %v119_v1 }
   0x2   :  { %8 = vsyncpa [#allocation3], 0  ;;  %21 = vperm.xlu0 %90, %v16_v0   ;;  %v18_v2 = vlaneseq  ;;  %v85_v3 = vld [vmem:[%s164_s2] ss:$0 sm:$0xff]  ;;  %vm33_vm1 = vcmask 130048   ;;  %vm58_vm2 = vcmask 7168  }
   0x3   :  { %v15_v4 = vld [vmem:[%s162_s0] sm:$0xff]  ;;  %s120_s0 = smov [#allocation2]  }
   0x4   :  { %v19_v5 = vand.u32 127, %v18_v2  ;;  %v30_v6 = vsub.f32 %v15_v4, %v85_v3  ;;  %s77_s1 = sshll.u32 %s120_s0, 4  ;;  %s78_s1 = int_to_ptr.vmem [resolvable:$true] %s77_s1 }
   0x5   :  { %s95_s18 = scalar_lea.vmem %s78_s1, 128  ;;  %p100_p1 = scmp.lt.s32.totalorder %s78_s1, %s78_s1 }
   0x6   :  { %p96_p0 = scmp.ne.s32.totalorder %s78_s1, %s95_s18  ;;  %p101_p2 = scmp.lt.s32.totalorder %s95_s18, %s95_s18 }
   0x8   :  { %p102_p3 = por %p101_p2, %p100_p1 }
   0xa   :  { %p103_p4 = pnand %p102_p3, %p96_p0 }
  0x81   :  { %v22_v7 = vpop.permute.xlu0 %21 }
  0x82   :  { %vm23_vm0 = vcmp.eq.s32.totalorder %v19_v5, %v22_v7 }
  0x83   :  { %v31_v8 = vsel %vm23_vm0, %v30_v6, %v15_v4 }
  0x84   :  { %v32_v9 = vmul.f32 30.0, %v31_v8 }
  0x86   :  { %v34_v10 = vsel %vm33_vm1, %v32_v9, -inf  ;;  %v46_v16 = vsel %vm23_vm0, %v32_v9, 0.0 }
  0x87   :  { %35 = vmax.xlane.f32.xlu0 %v34_v10  ;;  %v47_v17 = vsel %vm33_vm1, %v46_v16, 0.0 }
 0x114   :  { %v36_v11 = vpop.xlane.xlu0 %35 }
 0x115   :  { %v37_v12 = vsub.f32 %v32_v9, %v36_v11 }
 0x117   :  { %v38_v13 = vmul.f32 1.442695, %v37_v12 }
 0x119   :  { %91 = vpow2.f32 %v38_v13 }
 0x123   :  { %v92_v14 = vpop.eup %91 }
 0x124   :  { %v40_v15 = vsel %vm33_vm1, %v92_v14, 0.0 }
 0x125   :  { %41 = vadd.xlane.f32.xlu1 %v40_v15 }
 0x129   :  { %48 = vadd.xlane.f32.xlu1 %v47_v17 }
 0x1b2   :  { %v42_v18 = vpop.xlane.xlu1 %41 }
 0x1b3   :  { %93 = vlog2.f32 %v42_v18 }
 0x1b6   :  { %v49_v22 = vpop.xlane.xlu1 %48 }
 0x1bd   :  { %v94_v19 = vpop.eup %93 }
 0x1be   :  { %v44_v20 = vmul.f32 0.6931472, %v94_v19 }
 0x1c0   :  { %v45_v21 = vadd.f32 %v44_v20, %v36_v11 }
 0x1c2   :  { %v50_v23 = vsub.f32 %v45_v21, %v49_v22 }
 0x1c4   :  { %v59_v24 = vsel %vm58_vm2, %v50_v23, 0.0 }
 0x1c5   :  { %60 = vadd.xlane.f32.xlu1 %v59_v24 }
 0x252   :  { %v61_v25 = vpop.xlane.xlu1 %60 }
 0x253   :  { %v62_v26 = vrot.slane %v61_v25, 4 }
 0x255   :  { %v63_v27 = vadd.f32 %v62_v26, %v61_v25 }
 0x257   :  { %v64_v28 = vrot.slane %v63_v27, 2 }
 0x259   :  { %v65_v29 = vadd.f32 %v64_v28, %v63_v27 }
 0x25b   :  { %v66_v30 = vrot.slane %v65_v29, 1 }
 0x25d   :  { %v67_v31 = vadd.f32 %v66_v30, %v65_v29 }
 0x25f   :  { %86 = vpush %v67_v31 }
 0x290   :  { %s87_s2 = spop %86 }
 0x291   :  { %v69_v32 = vstv %s87_s2 }
 0x292   :  { %70 = vst [vmem:[#allocation2] sm:$0xff] %v69_v32 }
 0x293   :  { %106 = shalt.err (!%p103_p4)
}
 0x294   :  { %s107_s21 = scalar_lea.hbm %s165_s3, 128 }
 0x295   :  { %p108_p5 = scmp.ne.s32.totalorder %s165_s3, %s107_s21  ;;  %p111_p6 = scmp.lt.u32.totalorder %s107_s21, %s165_s3 }
 0x297   :  { %p113_p7 = pnand %p111_p6, %p108_p5 }
 0x299   :  { %116 = shalt.err (!%p113_p7)
}
 0x29a   :  { %80 = dma.vmem_to_hbm [thread:$0]  %s78_s1, 128, %s165_s3, [#allocation3]  }
 0x29b   :  { %117 = dma.done.wait [#allocation3], 128  }
 0x29c   :  { %118 = vsyncadd [#allocation3], 4294967168 }
 0x29d   :  { %84 = vsyncpa [#allocation3], 1 }

</bundles_post_ra>
